<compile_context>
chip_gen: v7x
topology: tpu7x:2x2x1
jax: 0.10.0
libtpu: 0.0.40
codegen_flags: <defaults>
</compile_context>

<pallas_src>
import functools

import numpy as np
import jax
import jax.numpy as jnp
from jax import lax
from jax.experimental import pallas as pl
from jax.experimental.pallas import tpu as pltpu


def _round_up(x, m):
    return (x + m - 1) // m * m


def _merge_prompt_kernel(ids_ref, rw_ref, out_ref, *, id_offset, n_rows, use_mxu):
    """Embedding gather: out[t] = running_weight[ids[t] - id_offset].

    ids_ref : (tT, 1)  int32  VMEM  tile of raw prompt token ids
    rw_ref  : (Rk, D)  f32    VMEM  running_weight table (resident block)
    out_ref : (tT, D)         VMEM  ret_embeds tile
    """
    rw = rw_ref[...]                                         # (Rk, D) f32
    ids = ids_ref[...]                                       # (tT, 1) int32

    if use_mxu:
        # One-hot MXU matmul; id_offset folded into the iota constant so there
        # is no per-tile vector subtract.  K = Rk (zero-padded to multiple of 8
        # in the wrapper); the MXU is otherwise idle in this kernel.
        Rk = rw.shape[0]
        col = lax.broadcasted_iota(jnp.int32, (ids.shape[0], Rk), 1) + id_offset
        onehot = (ids == col).astype(rw.dtype)               # (tT, Rk) exact 0/1
        out = jnp.dot(onehot, rw, preferred_element_type=jnp.float32)
        # TODO(synk): on v5e, casting onehot/rw to bf16 would halve MXU passes;
        #             kept f32 for bit-exactness with the reference.
    else:
        # Tiny R fallback: VPU select / multiply-accumulate chain.
        out = (ids == id_offset).astype(rw.dtype) * rw[0:1, :]
        for r in range(1, n_rows):
            m = (ids == (id_offset + r)).astype(rw.dtype)     # (tT, 1)
            out = out + m * rw[r:r + 1, :]                    # (tT, D)

    # NOTE: out-of-range ids (outside [id_offset, id_offset + R)) produce zero
    # rows here, whereas PyTorch F.embedding would raise; validate upstream.
    out_ref[...] = out.astype(out_ref.dtype)


def _plan_token_tiles(T, token_tile):
    """Pick (tT, n_tiles): tT multiple of 8 sublanes, grid even (v7x 2-TC split)."""
    T8 = _round_up(max(int(T), 1), 8)
    if T8 <= 2 * token_tile:
        # Small T: exactly 2 tiles so both v7x TensorCores get work while the
        # ~0.35us per-grid-step overhead stays amortized.
        tT = _round_up(-(-T8 // 2), 8)
        n_tiles = 2
    else:
        tT = _round_up(token_tile, 8)
        n_tiles = -(-T8 // tT)
        if n_tiles % 2:
            n_tiles += 1
    return tT, n_tiles


def _estimate_vmem_bytes(tT, D, Rk, out_itemsize):
    lane_d = _round_up(D, 128)
    out_b = 2 * tT * lane_d * out_itemsize     # double-buffered output tiles
    ids_b = 2 * tT * 128 * 4                   # (tT, 1) int32 pads lanes to 128
    rw_b = 2 * _round_up(Rk, 8) * lane_d * 4   # resident block (default 2 bufs)
    return out_b + ids_b + rw_b


_VMEM_TILE_BUDGET = 24 * 1024 * 1024   # conservative: v7x has 64 MiB physical VMEM


def merge_prompt_encoder_forward(prompt_token_ids, router_full, enc_weights, *,
                                 task_id, id_offset, n_prompts, embedding_dim,
                                 token_tile=1024, mxu_threshold=2,
                                 out_dtype=jnp.float32):
    """Eval-path forward of MergePromptEncoderOld.

    Glue (task-row select, vstack, running_weight matvec) stays in JAX; the
    Pallas kernel is the per-token embedding gather over running_weight.
    """
    D = int(embedding_dim)

    # ---- glue (hoisted out of the kernel) ----------------------------------
    router = router_full[task_id].astype(jnp.float32)                    # (P,)
    z = jnp.concatenate([w.astype(jnp.float32) for w in enc_weights], axis=0)
    z2 = z.reshape(n_prompts, -1)                                        # (P, R*D)
    rw = jnp.matmul(router, z2).reshape(-1, D)                           # (R, D)
    R = int(rw.shape[0])

    use_mxu = R >= mxu_threshold
    Rk = _round_up(R, 8) if use_mxu else R
    if Rk != R:
        # Zero rows are never selected by in-range ids; keeps MXU K aligned.
        rw = jnp.pad(rw, ((0, Rk - R), (0, 0)))

    ids = prompt_token_ids.reshape(-1).astype(jnp.int32)
    T = int(ids.shape[0])

    # ---- token tiling under an explicit VMEM budget -------------------------
    out_itemsize = int(jnp.dtype(out_dtype).itemsize)
    tT, n_tiles = _plan_token_tiles(T, token_tile)
    while tT > 8 and _estimate_vmem_bytes(tT, D, Rk, out_itemsize) > _VMEM_TILE_BUDGET:
        tT = max(8, _round_up(tT // 2, 8))
        n_tiles = -(-_round_up(T, 8) // tT)
        if n_tiles % 2:
            n_tiles += 1
    T_pad = tT * n_tiles

    if T_pad != T:
        # Padded tail rows select rw[0]; they are sliced off below.
        ids = jnp.pad(ids, (0, T_pad - T), constant_values=id_offset)
    ids2 = ids.reshape(T_pad, 1)                                         # (T_pad, 1)

    vmem_limit = int(min(48 * 1024 * 1024,
                         max(32 * 1024 * 1024,
                             _estimate_vmem_bytes(tT, D, Rk, out_itemsize)
                             + 8 * 1024 * 1024)))

    kernel = functools.partial(_merge_prompt_kernel, id_offset=int(id_offset),
                               n_rows=R, use_mxu=use_mxu)

    out = pl.pallas_call(
        kernel,
        out_shape=jax.ShapeDtypeStruct((T_pad, D), out_dtype),
        grid_spec=pltpu.PrefetchScalarGridSpec(
            num_scalar_prefetch=0,
            grid=(n_tiles,),
            in_specs=[
                # ids: one (tT, 1) tile per grid step (double-buffered; the
                # 128-lane padding is accounted for in the VMEM budget above).
                pl.BlockSpec((tT, 1), lambda i: (i, 0)),
                # running_weight: constant index map -> fetched once, resident.
                # NOTE: pipeline_mode=pl.Buffered(1) would drop the second copy
                #       once rw grows large; left at default for portability.
                pl.BlockSpec((Rk, D), lambda i: (0, 0)),
            ],
            out_specs=pl.BlockSpec((tT, D), lambda i: (i, 0)),
        ),
        compiler_params=pltpu.CompilerParams(
            dimension_semantics=("parallel",),      # megacore split on v7x
            vmem_limit_bytes=vmem_limit),
    )(ids2, rw)

    return out[:T]


if __name__ == "__main__":
    # Small config consistent with the module:
    #   n_tasks=2, n_prompts(P)=4, 2 sub-encoders of length L=8, D=128
    #   z = vstack -> (16, 128) -> view(4, 512); running_weight -> (R=4, 128)
    #   T=512 prompt-token occurrences -> 2 tiles of 256 rows (lane-dense D=128)
    n_tasks, n_prompts, n_enc, L, D = 2, 4, 2, 8, 128
    id_offset = 100
    task_id = 0
    T = 512

    key = jax.random.PRNGKey(0)
    k1, k2, k3, k4 = jax.random.split(key, 4)

    # self.router = uniform(-0.001, 0.001) of shape (n_tasks, n_prompts)
    router_full = jax.random.uniform(k1, (n_tasks, n_prompts),
                                     minval=-0.001, maxval=0.001,
                                     dtype=jnp.float32)
    # sub-encoder embedding tables (torch.nn.Embedding(length, embedding_dim))
    w0 = jax.random.normal(k2, (L, D), dtype=jnp.float32)
    w1 = jax.random.normal(k3, (L, D), dtype=jnp.float32)

    R = (n_enc * L) // n_prompts   # rows of running_weight = 4
    # prompt ids live in [id_offset, id_offset + R)
    prompt_token_ids = jax.random.randint(k4, (T,), id_offset, id_offset + R,
                                          dtype=jnp.int32)

    # Pure-JAX reference mirroring the PyTorch eval-mode forward exactly.
    router = router_full[task_id]
    z_ref = jnp.concatenate([w0, w1], axis=0).reshape(n_prompts, -1)
    rw_ref = (router @ z_ref).reshape(-1, D)
    ref = rw_ref[prompt_token_ids - id_offset]

    # Default path: one-hot gather on the (otherwise idle) MXU.
    out = merge_prompt_encoder_forward(
        prompt_token_ids, router_full, [w0, w1],
        task_id=task_id, id_offset=id_offset,
        n_prompts=n_prompts, embedding_dim=D)
    out = jax.block_until_ready(out)
    assert out.shape == (T, D)
    assert np.allclose(np.asarray(out), np.asarray(ref), atol=1e-5, rtol=1e-5)

    # Also exercise the VPU select-chain fallback used for R < mxu_threshold.
    out_vpu = merge_prompt_encoder_forward(
        prompt_token_ids, router_full, [w0, w1],
        task_id=task_id, id_offset=id_offset,
        n_prompts=n_prompts, embedding_dim=D,
        mxu_threshold=1_000_000)
    out_vpu = jax.block_until_ready(out_vpu)
    assert np.allclose(np.asarray(out_vpu), np.asarray(ref), atol=1e-5, rtol=1e-5)

    print("KERNEL_OK")
</pallas_src>

<mosaic_0001>
module attributes {stable_mosaic.version = 11 : i64} {
  func.func @_merge_prompt_kernel(%arg0: i32, %arg1: memref<256x1xi32, #tpu.memory_space<vmem>>, %arg2: memref<8x128xf32, #tpu.memory_space<vmem>>, %arg3: memref<256x128xf32, #tpu.memory_space<vmem>>) attributes {dimension_semantics = [#tpu.dimension_semantics<parallel>], iteration_bounds = array<i64: 2>, scalar_prefetch = 0 : i64, scratch_operands = 0 : i64, tpu.core_type = #tpu.core_type<tc>, window_params = [{transform_indices = @transform_0, window_bounds = array<i64: 256, 1>}, {pipeline_mode = #tpu.pipeline_mode<synchronous>, transform_indices = @transform_1, window_bounds = array<i64: 8, 128>}, {transform_indices = @transform_2, window_bounds = array<i64: 256, 128>}]} {
    %c0 = arith.constant 0 : index
    %c0_0 = arith.constant 0 : index
    %0 = vector.load %arg2[%c0, %c0_0] : memref<8x128xf32, #tpu.memory_space<vmem>>, vector<8x128xf32>
    %c0_1 = arith.constant 0 : index
    %c0_2 = arith.constant 0 : index
    %1 = vector.load %arg1[%c0_1, %c0_2] : memref<256x1xi32, #tpu.memory_space<vmem>>, vector<256x1xi32>
    %2 = tpu.iota {dimensions = array<i32: 1>} : vector<256x8xi32>
    %c100_i32 = arith.constant 100 : i32
    %3 = vector.broadcast %c100_i32 : i32 to vector<256x8xi32>
    %4 = arith.addi %2, %3 : vector<256x8xi32>
    %5 = vector.broadcast %1 : vector<256x1xi32> to vector<256x8xi32>
    %6 = arith.cmpi eq, %5, %4 : vector<256x8xi32>
    %7 = arith.extui %6 : vector<256x8xi1> to vector<256x8xi32>
    %8 = arith.sitofp %7 : vector<256x8xi32> to vector<256x8xf32>
    %cst = arith.constant dense<0.000000e+00> : vector<256x128xf32>
    %9 = tpu.matmul %8, %0, %cst {dimension_numbers = #tpu.dot_dimension_numbers<[1], [0], [0], [1], [0, 0, 1, 1], [], []>} : vector<256x8xf32>, vector<8x128xf32>, vector<256x128xf32> -> vector<256x128xf32>
    %c0_3 = arith.constant 0 : index
    %c0_4 = arith.constant 0 : index
    %10 = vector.load %arg3[%c0_3, %c0_4] : memref<256x128xf32, #tpu.memory_space<vmem>>, vector<256x128xf32>
    tpu.vector_store %arg3[%c0_3, %c0_4], %9 {strides = array<i32>} : memref<256x128xf32, #tpu.memory_space<vmem>>, vector<256x128xf32>,
    return
  }
  func.func @transform_0(%arg0: i32) -> (i32, i32) {
    %c0_i32 = arith.constant 0 : i32
    %c0_i32_0 = arith.constant 0 : i32
    return %arg0, %c0_i32 : i32, i32
  }
  func.func @transform_1(%arg0: i32) -> (i32, i32) {
    %c0_i32 = arith.constant 0 : i32
    %c0_i32_0 = arith.constant 0 : i32
    %c0_i32_1 = arith.constant 0 : i32
    return %c0_i32, %c0_i32_0 : i32, i32
  }
  func.func @transform_2(%arg0: i32) -> (i32, i32) {
    %c0_i32 = arith.constant 0 : i32
    %c0_i32_0 = arith.constant 0 : i32
    return %arg0, %c0_i32 : i32, i32
  }
}

</mosaic_0001>

<bundles_post_ra>
// kernel: tpu_custom_call.1
= control target key start
LH: loop header
LB: loop body
LE: loop exit
PB: predicated region body
PF: predicated region fallthrough
CT: control target
= control target key end

     0   :  { %7 = vsyncpa [#allocation3], 0  ;;  %s1370_s0 = inlined_call_operand.vmem [shape: s32[512,1], index: 0, kind: input, shape index: {}]   ;;  %s1371_s1 = inlined_call_operand.vmem [shape: f32[8,128], index: 1, kind: input, shape index: {}]   ;;  %s1372_s2 = inlined_call_operand.hbm [shape: f32[512,128], index: 2, kind: output, shape index: {}]  }
   0x1   :  { %9 = vsyncpa [#allocation3 + $0x1], 0  ;;  %s1094_s9 = smov 0   ;;  %s1096_s10 = smov 0  }
   0x2   :  { %s1098_s11 = smov 0   ;;  %s1100_s12 = smov 0  }
   0x3 LB: > { %s1115_s13 = sadd.s32 4294967295, %s1072_s12   ;;  %s803_s14 = sadd.s32 4294967294, %s1072_s12   ;;  %s1072_s12 = sphi %s1100_s12, %s1378_s12   ;;  %s1068_s11 = sphi %s1098_s11, %s1377_s11   ;;  %s1064_s10 = sphi %s1096_s10, %s1376_s10   ;;  %s1060_s9 = sphi %s1094_s9, %s1375_s9  }
   0x4   : > { %s1119_s15 = sadd.s32 1, %s1072_s12   ;;  %s69_s16 = sadd.s32 1, %s1068_s11 }
   0x5   : > { %s66_s17 = ssub.s32 %s1072_s12, %s1119_s15  ;;  %p79_p0 = scmp.ne.s32.totalorder %s1068_s11, %s1064_s10 }
   0x6   : > { %p67_p1 = scmp.eq.s32.totalorder %s66_s17, 0  ;;  %p80_p2 = scmp.eq.s32.totalorder %s1115_s13, 1 }
   0x7   : > { %p85_p3 = scmp.ne.s32.totalorder %s1064_s10, %s1060_s9  ;;  %p86_p4 = scmp.eq.s32.totalorder %s803_s14, 1 }
   0x8   : > { %s1130_s18 = scalar_select %p67_p1, %s1068_s11, %s69_s16  }
   0x9   : > { %p1132_p5 = por %p80_p2, %p79_p0  ;;  %p1136_p6 = por %p86_p4, %p85_p3 }
   0xa   : > { %p806_p7 = scmp.ge.s32.totalorder %s1072_s12, 1  ;;  %p116_p8 = scmp.lt.s32.totalorder %s1072_s12, 3 }
   0xc   : > { %p117_p9 = pnand %p806_p7, %p116_p8 }
   0xd   : > { %s808_s21 = sshll.u32 (!%p117_p9), %s1115_s13, 5  ;;  %v1074_v0 = vmov (!%p117_p9), 0   ;;  %v145_v9 = vld [vmem:[%s1371_s1] sm:$0xff] (!%p117_p9)  ;;  %v178_v34 = vlaneseq (!%p117_p9)  ;;  %vm373_vm0 = vcmask (!%p117_p9), 64512   ;;  %v1075_v39 = vmov (!%p117_p9), 0.0   ;;  %s135_s28 = sand.u32 (!%p117_p9), 1, %s1064_s10  }
   0xe   : > { %120 = sbr.rel (%p117_p9) target bundleno = 443 (0x1bb), region = 28  ;;  %1009 = vset.pattern.permute.xlu1 (!%p117_p9), %v1074_v0  ;;  %1008 = vset.pattern.permute.xlu0 (!%p117_p9), %v1074_v0  ;;  %p139_p10 = scmp.lt.s32.totalorder (!%p117_p9), %s808_s21, 63 }
   0xf   : > { %913 = vmatprep.subr.mxu0 (!%p117_p9), %v145_v9  ;;  %963 = vmatprep.subr.mxu1 (!%p117_p9), %v145_v9  ;;  %v179_v35 = vand.u32 (!%p117_p9), 127, %v178_v34  ;;  %s807_s29 = sshll.u32 (!%p117_p9), %s135_s28, 8  ;;  %s879_s3 = sshll.u32 (!%p117_p9), %s1115_s13, 12 }
  0x10   : > { %914 = vmatpush3.msra.mxu0 (!%p117_p9), %v145_v9  ;;  %964 = vmatpush3.msra.mxu1 (!%p117_p9), %v145_v9  ;;  %s1284_s30 = scalar_lea.vmem (!%p117_p9), [#allocation2], %s807_s29  ;;  %s1319_s7 = scalar_lea.hbm (!%p117_p9), %s1372_s2, %s879_s3 }
  0x11   : > { %v1183_v36 = vadd.s32 (!%p117_p9), 100, %v179_v35  ;;  %s741_s4 = sshll.u32 (!%p117_p9), %s1284_s30, 4  ;;  %s1329_s8 = scalar_lea.sflag (!%p117_p9), [#allocation3], %s135_s28  ;;  %s1321_s4 = int_to_ptr.vmem [resolvable:$true] %s741_s4 }
  0x12   : > { %s1010_s13 = scalar_lea.vmem (!%p117_p9), %s1321_s4, 4096  ;;  %s1076_s14 = smov (!%p117_p9), [#allocation2]  }
  0x13   : > { %p1011_p11 = scmp.ne.s32.totalorder (!%p117_p9), %s1321_s4, %s1010_s13  ;;  %s1014_s16 = sshll.u32 (!%p117_p9), %s1076_s14, 4  ;;  %s1015_s16 = int_to_ptr.vmem [resolvable:$false] %s1014_s16 }
  0x14   : > { %s1016_s17 = scalar_lea.vmem (!%p117_p9), %s1015_s16, 8192  ;;  %p1017_p0 = scmp.lt.s32.totalorder (!%p117_p9), %s1321_s4, %s1015_s16 }
  0x15   : > { %s1380_s21 = smov (!%p139_p10, %s808_s21), 63  ;;  %p1012_p12 = pnand %p1011_p11, %p1132_p5 }
  0x16   : > { %s809_s22 = sshll.u32 %s1380_s21, 3  ;;  %p1018_p1 = scmp.lt.s32.totalorder %s1016_s17, %s1010_s13 }
  0x17   : > { %s1146_s25 = scalar_lea.vmem %s1370_s0, %s809_s22  ;;  %p1013_p13 = pneg %p1012_p12 }
  0x18   : > { %v147_v1 = vld [vmem:[%s1146_s25 + $0x8] sm:$0xff]  ;;  %v146_v2 = vld [vmem:[%s1146_s25] sm:$0xff]  ;;  %v164_v5 = vld [vmem:[%s1146_s25 + $0x90] sm:$0xff]  ;;  %p1019_p2 = por %p1018_p1, %p1017_p0 }
  0x19   : > { %185 = vperm.xlu1 %1009, %v147_v1   ;;  %182 = vperm.xlu0 %1008, %v146_v2   ;;  %v163_v3 = vld [vmem:[%s1146_s25 + $0x88] sm:$0xff]  ;;  %v162_v4 = vld [vmem:[%s1146_s25 + $0x80] sm:$0xff]  ;;  %v148_v6 = vld [vmem:[%s1146_s25 + $0x10] sm:$0xff] }
  0x1a   : > { %v165_v7 = vld [vmem:[%s1146_s25 + $0x98] sm:$0xff]  ;;  %v166_v10 = vld [vmem:[%s1146_s25 + $0xa0] sm:$0xff]  ;;  %v167_v12 = vld [vmem:[%s1146_s25 + $0xa8] sm:$0xff]  ;;  %p1020_p3 = pnand %p1019_p2, %p1013_p13 }
  0x1b   : > { %v149_v8 = vld [vmem:[%s1146_s25 + $0x18] sm:$0xff]  ;;  %v150_v11 = vld [vmem:[%s1146_s25 + $0x20] sm:$0xff]  ;;  %v151_v13 = vld [vmem:[%s1146_s25 + $0x28] sm:$0xff] }
  0x1c   : > { %v168_v14 = vld [vmem:[%s1146_s25 + $0xb0] sm:$0xff]  ;;  %v169_v16 = vld [vmem:[%s1146_s25 + $0xb8] sm:$0xff]  ;;  %v170_v18 = vld [vmem:[%s1146_s25 + $0xc0] sm:$0xff] }
  0x1d   : > { %233 = vperm.xlu1 %1009, %v163_v3   ;;  %230 = vperm.xlu0 %1008, %v162_v4   ;;  %v152_v15 = vld [vmem:[%s1146_s25 + $0x30] sm:$0xff]  ;;  %v153_v17 = vld [vmem:[%s1146_s25 + $0x38] sm:$0xff]  ;;  %v154_v19 = vld [vmem:[%s1146_s25 + $0x40] sm:$0xff] }
  0x1e   : > { %v171_v20 = vld [vmem:[%s1146_s25 + $0xc8] sm:$0xff]  ;;  %v172_v22 = vld [vmem:[%s1146_s25 + $0xd0] sm:$0xff]  ;;  %v173_v24 = vld [vmem:[%s1146_s25 + $0xd8] sm:$0xff] }
  0x1f   : > { %v155_v21 = vld [vmem:[%s1146_s25 + $0x48] sm:$0xff]  ;;  %v156_v23 = vld [vmem:[%s1146_s25 + $0x50] sm:$0xff]  ;;  %v157_v25 = vld [vmem:[%s1146_s25 + $0x58] sm:$0xff] }
  0x20   : > { %v174_v26 = vld [vmem:[%s1146_s25 + $0xe0] sm:$0xff]  ;;  %v175_v28 = vld [vmem:[%s1146_s25 + $0xe8] sm:$0xff]  ;;  %v176_v30 = vld [vmem:[%s1146_s25 + $0xf0] sm:$0xff] }
  0x21   : > { %236 = vperm.xlu1 %1009, %v164_v5   ;;  %188 = vperm.xlu0 %1008, %v148_v6   ;;  %v158_v27 = vld [vmem:[%s1146_s25 + $0x60] sm:$0xff]  ;;  %v159_v29 = vld [vmem:[%s1146_s25 + $0x68] sm:$0xff]  ;;  %v160_v31 = vld [vmem:[%s1146_s25 + $0x70] sm:$0xff] }
  0x22   : > { %v177_v32 = vld [vmem:[%s1146_s25 + $0xf8] sm:$0xff] }
  0x23   : > { %v161_v33 = vld [vmem:[%s1146_s25 + $0x78] sm:$0xff] }
  0x25   : > { %239 = vperm.xlu1 %1009, %v165_v7   ;;  %191 = vperm.xlu0 %1008, %v149_v8  }
  0x29   : > { %242 = vperm.xlu1 %1009, %v166_v10   ;;  %194 = vperm.xlu0 %1008, %v150_v11  }
  0x2d   : > { %245 = vperm.xlu1 %1009, %v167_v12   ;;  %197 = vperm.xlu0 %1008, %v151_v13  }
  0x31   : > { %248 = vperm.xlu1 %1009, %v168_v14   ;;  %200 = vperm.xlu0 %1008, %v152_v15  }
  0x35   : > { %251 = vperm.xlu1 %1009, %v169_v16   ;;  %203 = vperm.xlu0 %1008, %v153_v17  }
  0x39   : > { %254 = vperm.xlu1 %1009, %v170_v18   ;;  %206 = vperm.xlu0 %1008, %v154_v19  }
  0x3d   : > { %257 = vperm.xlu1 %1009, %v171_v20   ;;  %209 = vperm.xlu0 %1008, %v155_v21  }
  0x41   : > { %260 = vperm.xlu1 %1009, %v172_v22   ;;  %212 = vperm.xlu0 %1008, %v156_v23  }
  0x45   : > { %263 = vperm.xlu1 %1009, %v173_v24   ;;  %215 = vperm.xlu0 %1008, %v157_v25  }
  0x49   : > { %266 = vperm.xlu1 %1009, %v174_v26   ;;  %218 = vperm.xlu0 %1008, %v158_v27  }
  0x4d   : > { %269 = vperm.xlu1 %1009, %v175_v28   ;;  %221 = vperm.xlu0 %1008, %v159_v29  }
  0x51   : > { %272 = vperm.xlu1 %1009, %v176_v30   ;;  %224 = vperm.xlu0 %1008, %v160_v31  }
  0x55   : > { %275 = vperm.xlu1 %1009, %v177_v32   ;;  %227 = vperm.xlu0 %1008, %v161_v33  }
  0x98   : > { %v186_v37 = vpop.permute.xlu1 %185  ;;  %v183_v38 = vpop.permute.xlu0 %182 }
  0x99   : > { %vm278_vm1 = vcmp.eq.s32.totalorder %v186_v37, %v1183_v36  ;;  %vm277_vm2 = vcmp.eq.s32.totalorder %v183_v38, %v1183_v36 }
  0x9a   : > { %v811_v40 = vsel %vm278_vm1, 1.0, %v1075_v39  ;;  %v810_v41 = vsel %vm277_vm2, 1.0, %v1075_v39 }
  0x9b   : > { %915 = vmatprep.mubr.msk.f32.mxu0 %vm373_vm0, %v810_v41 }
  0x9c   : > { %v234_v42 = vpop.permute.xlu1 %233  ;;  %916 = vmatmul.mubr.msk.f32.vlgmr.msra.gmra.mrb[0].mxu0 %vm373_vm0, %v811_v40  ;;  %v231_v43 = vpop.permute.xlu0 %230 }
  0x9d   : > { %vm294_vm3 = vcmp.eq.s32.totalorder %v234_v42, %v1183_v36  ;;  %vm293_vm4 = vcmp.eq.s32.totalorder %v231_v43, %v1183_v36 }
  0x9e   : > { %v827_v44 = vsel %vm294_vm3, 1.0, %v1075_v39  ;;  %v826_v45 = vsel %vm293_vm4, 1.0, %v1075_v39 }
  0x9f   : > { %939 = vmatprep.mubr.msk.f32.mxu1 %vm373_vm0, %v826_v45 }
  0xa0   : > { %v237_v46 = vpop.permute.xlu1 %236  ;;  %940 = vmatmul.mubr.msk.f32.vlgmr.msra.gmra.mrb[0].mxu1 %vm373_vm0, %v827_v44  ;;  %v189_v47 = vpop.permute.xlu0 %188 }
  0xa1   : > { %vm295_vm5 = vcmp.eq.s32.totalorder %v237_v46, %v1183_v36  ;;  %vm279_vm6 = vcmp.eq.s32.totalorder %v189_v47, %v1183_v36 }
  0xa2   : > { %v828_v48 = vsel %vm295_vm5, 1.0, %v1075_v39  ;;  %v812_v49 = vsel %vm279_vm6, 1.0, %v1075_v39 }
  0xa3   : > { %918 = vmatprep.mubr.msk.f32.mxu0 %vm373_vm0, %v812_v49  ;;  %942 = vmatprep.mubr.msk.f32.mxu1 %vm373_vm0, %v828_v48 }
  0xa4   : > { %v240_v50 = vpop.permute.xlu1 %239  ;;  %v192_v51 = vpop.permute.xlu0 %191 }
  0xa5   : > { %vm296_vm7 = vcmp.eq.s32.totalorder %v240_v50, %v1183_v36  ;;  %vm280_vm8 = vcmp.eq.s32.totalorder %v192_v51, %v1183_v36 }
  0xa6   : > { %v829_v52 = vsel %vm296_vm7, 1.0, %v1075_v39  ;;  %v813_v53 = vsel %vm280_vm8, 1.0, %v1075_v39 }
  0xa7   : > { %919 = vmatmul.mubr.msk.f32.gmra.mrb[2].mxu0 %vm373_vm0, %v813_v53  ;;  %943 = vmatmul.mubr.msk.f32.gmra.mrb[2].mxu1 %vm373_vm0, %v829_v52 }
  0xa8   : > { %v243_v54 = vpop.permute.xlu1 %242  ;;  %v195_v55 = vpop.permute.xlu0 %194 }
  0xa9   : > { %vm297_vm9 = vcmp.eq.s32.totalorder %v243_v54, %v1183_v36  ;;  %vm281_vm10 = vcmp.eq.s32.totalorder %v195_v55, %v1183_v36 }
  0xaa   : > { %v830_v56 = vsel %vm297_vm9, 1.0, %v1075_v39  ;;  %v814_v57 = vsel %vm281_vm10, 1.0, %v1075_v39 }
  0xab   : > { %921 = vmatprep.mubr.msk.f32.mxu0 %vm373_vm0, %v814_v57  ;;  %945 = vmatprep.mubr.msk.f32.mxu1 %vm373_vm0, %v830_v56 }
  0xac   : > { %v246_v58 = vpop.permute.xlu1 %245  ;;  %v198_v59 = vpop.permute.xlu0 %197 }
  0xad   : > { %vm298_vm11 = vcmp.eq.s32.totalorder %v246_v58, %v1183_v36  ;;  %vm282_vm12 = vcmp.eq.s32.totalorder %v198_v59, %v1183_v36 }
  0xae   : > { %v831_v60 = vsel %vm298_vm11, 1.0, %v1075_v39  ;;  %v815_v61 = vsel %vm282_vm12, 1.0, %v1075_v39 }
  0xaf   : > { %922 = vmatmul.mubr.msk.f32.gmra.mrb[4].mxu0 %vm373_vm0, %v815_v61  ;;  %946 = vmatmul.mubr.msk.f32.gmra.mrb[4].mxu1 %vm373_vm0, %v831_v60 }
  0xb0   : > { %v249_v62 = vpop.permute.xlu1 %248  ;;  %v201_v63 = vpop.permute.xlu0 %200 }
  0xb1   : > { %vm299_vm13 = vcmp.eq.s32.totalorder %v249_v62, %v1183_v36  ;;  %vm283_vm14 = vcmp.eq.s32.totalorder %v201_v63, %v1183_v36 }
  0xb2   : > { %v832_v0 = vsel %vm299_vm13, 1.0, %v1075_v39  ;;  %v816_v1 = vsel %vm283_vm14, 1.0, %v1075_v39 }
  0xb3   : > { %924 = vmatprep.mubr.msk.f32.mxu0 %vm373_vm0, %v816_v1  ;;  %948 = vmatprep.mubr.msk.f32.mxu1 %vm373_vm0, %v832_v0 }
  0xb4   : > { %v252_v2 = vpop.permute.xlu1 %251  ;;  %v204_v3 = vpop.permute.xlu0 %203 }
  0xb5   : > { %vm300_vm15 = vcmp.eq.s32.totalorder %v252_v2, %v1183_v36  ;;  %vm284_vm1 = vcmp.eq.s32.totalorder %v204_v3, %v1183_v36 }
  0xb6   : > { %v833_v4 = vsel %vm300_vm15, 1.0, %v1075_v39  ;;  %v817_v5 = vsel %vm284_vm1, 1.0, %v1075_v39 }
  0xb7   : > { %925 = vmatmul.mubr.msk.f32.gmra.mrb[6].mxu0 %vm373_vm0, %v817_v5  ;;  %949 = vmatmul.mubr.msk.f32.gmra.mrb[6].mxu1 %vm373_vm0, %v833_v4 }
  0xb8   : > { %v255_v6 = vpop.permute.xlu1 %254  ;;  %v207_v7 = vpop.permute.xlu0 %206 }
  0xb9   : > { %vm301_vm2 = vcmp.eq.s32.totalorder %v255_v6, %v1183_v36  ;;  %vm285_vm3 = vcmp.eq.s32.totalorder %v207_v7, %v1183_v36 }
  0xba   : > { %v834_v8 = vsel %vm301_vm2, 1.0, %v1075_v39  ;;  %v818_v9 = vsel %vm285_vm3, 1.0, %v1075_v39 }
  0xbb   : > { %927 = vmatprep.mubr.msk.f32.mxu0 %vm373_vm0, %v818_v9  ;;  %951 = vmatprep.mubr.msk.f32.mxu1 %vm373_vm0, %v834_v8 }
  0xbc   : > { %v258_v10 = vpop.permute.xlu1 %257  ;;  %v210_v11 = vpop.permute.xlu0 %209 }
  0xbd   : > { %vm302_vm4 = vcmp.eq.s32.totalorder %v258_v10, %v1183_v36  ;;  %vm286_vm5 = vcmp.eq.s32.totalorder %v210_v11, %v1183_v36 }
  0xbe   : > { %v835_v12 = vsel %vm302_vm4, 1.0, %v1075_v39  ;;  %v819_v13 = vsel %vm286_vm5, 1.0, %v1075_v39 }
  0xbf   : > { %928 = vmatmul.mubr.msk.f32.gmra.mrb[8].mxu0 %vm373_vm0, %v819_v13  ;;  %952 = vmatmul.mubr.msk.f32.gmra.mrb[8].mxu1 %vm373_vm0, %v835_v12 }
  0xc0   : > { %v261_v14 = vpop.permute.xlu1 %260  ;;  %v213_v15 = vpop.permute.xlu0 %212 }
  0xc1   : > { %vm303_vm6 = vcmp.eq.s32.totalorder %v261_v14, %v1183_v36  ;;  %vm287_vm7 = vcmp.eq.s32.totalorder %v213_v15, %v1183_v36 }
  0xc2   : > { %v836_v16 = vsel %vm303_vm6, 1.0, %v1075_v39  ;;  %v820_v17 = vsel %vm287_vm7, 1.0, %v1075_v39 }
  0xc3   : > { %930 = vmatprep.mubr.msk.f32.mxu0 %vm373_vm0, %v820_v17  ;;  %954 = vmatprep.mubr.msk.f32.mxu1 %vm373_vm0, %v836_v16 }
  0xc4   : > { %v264_v18 = vpop.permute.xlu1 %263  ;;  %v216_v19 = vpop.permute.xlu0 %215 }
  0xc5   : > { %vm304_vm8 = vcmp.eq.s32.totalorder %v264_v18, %v1183_v36  ;;  %vm288_vm9 = vcmp.eq.s32.totalorder %v216_v19, %v1183_v36 }
  0xc6   : > { %v837_v20 = vsel %vm304_vm8, 1.0, %v1075_v39  ;;  %v821_v21 = vsel %vm288_vm9, 1.0, %v1075_v39 }
  0xc7   : > { %931 = vmatmul.mubr.msk.f32.gmra.mrb[10].mxu0 %vm373_vm0, %v821_v21  ;;  %955 = vmatmul.mubr.msk.f32.gmra.mrb[10].mxu1 %vm373_vm0, %v837_v20 }
  0xc8   : > { %v267_v22 = vpop.permute.xlu1 %266  ;;  %v219_v23 = vpop.permute.xlu0 %218 }
  0xc9   : > { %vm305_vm10 = vcmp.eq.s32.totalorder %v267_v22, %v1183_v36  ;;  %vm289_vm11 = vcmp.eq.s32.totalorder %v219_v23, %v1183_v36 }
  0xca   : > { %v838_v24 = vsel %vm305_vm10, 1.0, %v1075_v39  ;;  %v822_v25 = vsel %vm289_vm11, 1.0, %v1075_v39 }
  0xcb   : > { %933 = vmatprep.mubr.msk.f32.mxu0 %vm373_vm0, %v822_v25  ;;  %957 = vmatprep.mubr.msk.f32.mxu1 %vm373_vm0, %v838_v24 }
  0xcc   : > { %v270_v26 = vpop.permute.xlu1 %269  ;;  %v222_v27 = vpop.permute.xlu0 %221 }
  0xcd   : > { %vm306_vm12 = vcmp.eq.s32.totalorder %v270_v26, %v1183_v36  ;;  %vm290_vm13 = vcmp.eq.s32.totalorder %v222_v27, %v1183_v36 }
  0xce   : > { %v839_v28 = vsel %vm306_vm12, 1.0, %v1075_v39  ;;  %v823_v29 = vsel %vm290_vm13, 1.0, %v1075_v39 }
  0xcf   : > { %934 = vmatmul.mubr.msk.f32.gmra.mrb[12].mxu0 %vm373_vm0, %v823_v29  ;;  %958 = vmatmul.mubr.msk.f32.gmra.mrb[12].mxu1 %vm373_vm0, %v839_v28 }
  0xd0   : > { %v273_v30 = vpop.permute.xlu1 %272  ;;  %v225_v31 = vpop.permute.xlu0 %224 }
  0xd1   : > { %vm307_vm14 = vcmp.eq.s32.totalorder %v273_v30, %v1183_v36  ;;  %vm291_vm15 = vcmp.eq.s32.totalorder %v225_v31, %v1183_v36 }
  0xd2   : > { %v840_v32 = vsel %vm307_vm14, 1.0, %v1075_v39  ;;  %v824_v33 = vsel %vm291_vm15, 1.0, %v1075_v39 }
  0xd3   : > { %936 = vmatprep.mubr.msk.f32.mxu0 %vm373_vm0, %v824_v33  ;;  %960 = vmatprep.mubr.msk.f32.mxu1 %vm373_vm0, %v840_v32 }
  0xd4   : > { %v276_v34 = vpop.permute.xlu1 %275  ;;  %v228_v35 = vpop.permute.xlu0 %227 }
  0xd5   : > { %vm308_vm1 = vcmp.eq.s32.totalorder %v276_v34, %v1183_v36  ;;  %vm292_vm2 = vcmp.eq.s32.totalorder %v228_v35, %v1183_v36 }
  0xd6   : > { %v841_v37 = vsel %vm308_vm1, 1.0, %v1075_v39  ;;  %v825_v38 = vsel %vm292_vm2, 1.0, %v1075_v39 }
  0xd7   : > { %937 = vmatmul.mubr.msk.f32.gmra.mrb[14].mxu0 %vm373_vm0, %v825_v38  ;;  %961 = vmatmul.mubr.msk.f32.gmra.mrb[14].mxu1 %vm373_vm0, %v841_v37 }
 0x16f   : > { %v917_v40 = vpop.f32.mrb[0].mxu0 }
 0x170   : > { %696 = vst [vmem:[%s1284_s30 + $0x8] sm:$0xff] %v917_v40  ;;  %v536_v36 = vpop.f32.mrb[1].mxu0 }
 0x171   : > { %695 = vst [vmem:[%s1284_s30] sm:$0xff] %v536_v36 }
 0x173   : > { %v941_v39 = vpop.f32.mrb[0].mxu1 }
 0x174   : > { %712 = vst [vmem:[%s1284_s30 + $0x88] sm:$0xff] %v941_v39  ;;  %v616_v41 = vpop.f32.mrb[1].mxu1 }
 0x175   : > { %711 = vst [vmem:[%s1284_s30 + $0x80] sm:$0xff] %v616_v41 }
 0x17a   : > { %v920_v42 = vpop.f32.mrb[2].mxu0  ;;  %v944_v43 = vpop.f32.mrb[2].mxu1 }
 0x17b   : > { %698 = vst [vmem:[%s1284_s30 + $0x18] sm:$0xff] %v920_v42  ;;  %714 = vst [vmem:[%s1284_s30 + $0x98] sm:$0xff] %v944_v43  ;;  %v546_v44 = vpop.f32.mrb[3].mxu0  ;;  %v626_v45 = vpop.f32.mrb[3].mxu1 }
 0x17c   : > { %697 = vst [vmem:[%s1284_s30 + $0x10] sm:$0xff] %v546_v44  ;;  %713 = vst [vmem:[%s1284_s30 + $0x90] sm:$0xff] %v626_v45 }
 0x182   : > { %v923_v46 = vpop.f32.mrb[4].mxu0  ;;  %v947_v47 = vpop.f32.mrb[4].mxu1 }
 0x183   : > { %700 = vst [vmem:[%s1284_s30 + $0x28] sm:$0xff] %v923_v46  ;;  %716 = vst [vmem:[%s1284_s30 + $0xa8] sm:$0xff] %v947_v47  ;;  %v556_v48 = vpop.f32.mrb[5].mxu0  ;;  %v636_v49 = vpop.f32.mrb[5].mxu1 }
 0x184   : > { %699 = vst [vmem:[%s1284_s30 + $0x20] sm:$0xff] %v556_v48  ;;  %715 = vst [vmem:[%s1284_s30 + $0xa0] sm:$0xff] %v636_v49 }
 0x18a   : > { %v926_v50 = vpop.f32.mrb[6].mxu0  ;;  %v950_v51 = vpop.f32.mrb[6].mxu1 }
 0x18b   : > { %702 = vst [vmem:[%s1284_s30 + $0x38] sm:$0xff] %v926_v50  ;;  %718 = vst [vmem:[%s1284_s30 + $0xb8] sm:$0xff] %v950_v51  ;;  %v566_v52 = vpop.f32.mrb[7].mxu0  ;;  %v646_v53 = vpop.f32.mrb[7].mxu1 }
 0x18c   : > { %701 = vst [vmem:[%s1284_s30 + $0x30] sm:$0xff] %v566_v52  ;;  %717 = vst [vmem:[%s1284_s30 + $0xb0] sm:$0xff] %v646_v53 }
 0x192   : > { %v929_v54 = vpop.f32.mrb[8].mxu0  ;;  %v953_v55 = vpop.f32.mrb[8].mxu1 }
 0x193   : > { %704 = vst [vmem:[%s1284_s30 + $0x48] sm:$0xff] %v929_v54  ;;  %720 = vst [vmem:[%s1284_s30 + $0xc8] sm:$0xff] %v953_v55  ;;  %v576_v56 = vpop.f32.mrb[9].mxu0  ;;  %v656_v57 = vpop.f32.mrb[9].mxu1 }
 0x194   : > { %703 = vst [vmem:[%s1284_s30 + $0x40] sm:$0xff] %v576_v56  ;;  %719 = vst [vmem:[%s1284_s30 + $0xc0] sm:$0xff] %v656_v57 }
 0x19a   : > { %v932_v58 = vpop.f32.mrb[10].mxu0  ;;  %v956_v59 = vpop.f32.mrb[10].mxu1 }
 0x19b   : > { %706 = vst [vmem:[%s1284_s30 + $0x58] sm:$0xff] %v932_v58  ;;  %722 = vst [vmem:[%s1284_s30 + $0xd8] sm:$0xff] %v956_v59  ;;  %v586_v60 = vpop.f32.mrb[11].mxu0  ;;  %v666_v61 = vpop.f32.mrb[11].mxu1 }
 0x19c   : > { %705 = vst [vmem:[%s1284_s30 + $0x50] sm:$0xff] %v586_v60  ;;  %721 = vst [vmem:[%s1284_s30 + $0xd0] sm:$0xff] %v666_v61 }
 0x1a2   : > { %v935_v62 = vpop.f32.mrb[12].mxu0  ;;  %v959_v63 = vpop.f32.mrb[12].mxu1 }
 0x1a3   : > { %708 = vst [vmem:[%s1284_s30 + $0x68] sm:$0xff] %v935_v62  ;;  %724 = vst [vmem:[%s1284_s30 + $0xe8] sm:$0xff] %v959_v63  ;;  %v596_v0 = vpop.f32.mrb[13].mxu0  ;;  %v676_v1 = vpop.f32.mrb[13].mxu1 }
 0x1a4   : > { %707 = vst [vmem:[%s1284_s30 + $0x60] sm:$0xff] %v596_v0  ;;  %723 = vst [vmem:[%s1284_s30 + $0xe0] sm:$0xff] %v676_v1 }
 0x1aa   : > { %v938_v2 = vpop.f32.mrb[14].mxu0  ;;  %v962_v3 = vpop.f32.mrb[14].mxu1 }
 0x1ab   : > { %710 = vst [vmem:[%s1284_s30 + $0x78] sm:$0xff] %v938_v2  ;;  %726 = vst [vmem:[%s1284_s30 + $0xf8] sm:$0xff] %v962_v3  ;;  %v606_v4 = vpop.f32.mrb[15].mxu0  ;;  %v686_v5 = vpop.f32.mrb[15].mxu1 }
 0x1ac   : > { %709 = vst [vmem:[%s1284_s30 + $0x70] sm:$0xff] %v606_v4  ;;  %725 = vst [vmem:[%s1284_s30 + $0xf0] sm:$0xff] %v686_v5 }
 0x1ad   : > { %1023 = shalt.err (!%p1020_p3)
}
 0x1ae   : > { %s1024_s21 = scalar_lea.hbm %s1319_s7, 4096  ;;  %s1028_s24 = scalar_lea.hbm %s1372_s2, 8192 }
 0x1af   : > { %p1025_p4 = scmp.ne.s32.totalorder %s1319_s7, %s1024_s21  ;;  %p1029_p9 = scmp.lt.u32.totalorder %s1319_s7, %s1372_s2 }
 0x1b0   : > { %p1030_p10 = scmp.lt.u32.totalorder %s1028_s24, %s1024_s21  ;;  %p1032_p12 = scmp.lt.u32.totalorder %s1024_s21, %s1319_s7 }
 0x1b1   : > { %p1026_p7 = pnand %p1025_p4, %p1132_p5 }
 0x1b2   : > { %p1031_p11 = por %p1030_p10, %p1029_p9 }
 0x1b3   : > { %p1027_p8 = pneg %p1026_p7 }
 0x1b4   : > { %p1033_p13 = por %p1032_p12, %p1031_p11 }
 0x1b6   : > { %p1034_p0 = pnand %p1033_p13, %p1027_p8 }
 0x1b8   : > { %1037 = shalt.err (!%p1034_p0)
}
 0x1b9   : > { %s1077_s27 = smov 128   ;;  %s1078_s28 = smov 8  }
 0x1ba   : > { %965 = dma.vmem_to_hbm [thread:$0]  (%p1132_p5), %s1321_s4, 4096, %s1319_s7, %s1329_s8, %s1077_s27, %s1077_s27, %s1078_s28  }
 0x1bb PF: > { %p971_p1 = scmp.ge.s32.totalorder %s1072_s12, 2  ;;  %s756_s29 = sand.u32 1, %s1060_s9  }
 0x1bc   : > { %s757_s30 = scalar_lea.sflag [#allocation3], %s756_s29 }
 0x1bd   : > { %p968_p2 = pnand %p971_p1, %p1136_p6 }
 0x1bf   : > { %1055 = dma.done.wait (!%p968_p2), %s757_s30, 4096  }
 0x1c0   : > { %1057 = vsyncadd (!%p968_p2), %s757_s30, 4294963200  ;;  %p12_p3 = scmp.ge.s32.totalorder %s1119_s15, 4   ;;  %s1375_s9 = smov %s1064_s10 }
 0x1c1   : > { %s1376_s10 = smov %s1068_s11  ;;  %s1377_s11 = smov %s1130_s18 }
 0x1c2   : > { %s1378_s12 = smov %s1119_s15  ;;  %14 = sbr.rel (!%p12_p3) target bundleno = 3 (0x3), region = 63 }
 0x1c9   :  { %762 = vsyncpa [#allocation3], 1 }
 0x1ca   :  { %764 = vsyncpa [#allocation3 + $0x1], 1 }

</bundles_post_ra>
